<compile_context>
chip_gen: v5e
topology: v5e:2x2
jax: 0.10.0
libtpu: 0.0.40
codegen_flags: <defaults>
</compile_context>

<pallas_src>
import jax
import jax.numpy as jnp
from jax.experimental import pallas as pl
from jax.experimental.pallas import tpu as pltpu


def _triangular_membership_kernel(x_ref, a_ref, c_ref, inv_l_ref, inv_r_ref, o_ref):
    x = x_ref[...]                                   # (tile_rows, lane)
    left = (x - a_ref[...]) * inv_l_ref[...]         # (1, lane) broadcasts over rows
    right = (c_ref[...] - x) * inv_r_ref[...]
    o_ref[...] = jnp.maximum(jnp.minimum(left, right), 0.0)


def triangular_membership(x, a, b, c, *, target_tile_bytes=2 << 20):
    """x: (N, D) float32; a, b, c: (D,) float32 -> (N, D) float32."""
    x = x.astype(jnp.float32)
    a = a.astype(jnp.float32)
    b = b.astype(jnp.float32)
    c = c.astype(jnp.float32)
    N, D = x.shape

    # Exact reciprocals of the clamped denominators, computed once on (D,) vectors.
    inv_l = 1.0 / jnp.maximum(b - a, 1e-8)
    inv_r = 1.0 / jnp.maximum(c - b, 1e-8)

    # --- choose a lane-dense working layout -------------------------------
    if D % 128 == 0:
        mode = "direct"
        lane = D
        xw = x
        rows = N
        a_row, c_row, il_row, ir_row = a, c, inv_l, inv_r
    elif (128 % D == 0) and ((N * D) % 128 == 0):
        mode = "flatten"
        lane = 128
        rep = 128 // D
        xw = x.reshape(-1, 128)
        rows = xw.shape[0]
        a_row = jnp.tile(a, rep)
        c_row = jnp.tile(c, rep)
        il_row = jnp.tile(inv_l, rep)
        ir_row = jnp.tile(inv_r, rep)
    else:
        mode = "pad"
        lane = pl.cdiv(D, 128) * 128
        pad = lane - D
        xw = jnp.pad(x, ((0, 0), (0, pad)))
        rows = N
        # Safe padding values: padded columns compute min((0-0)*1,(0-0)*1)=0.
        a_row = jnp.pad(a, (0, pad))
        c_row = jnp.pad(c, (0, pad))
        il_row = jnp.pad(inv_l, (0, pad), constant_values=1.0)
        ir_row = jnp.pad(inv_r, (0, pad), constant_values=1.0)

    a_row = a_row.reshape(1, lane)
    c_row = c_row.reshape(1, lane)
    il_row = il_row.reshape(1, lane)
    ir_row = ir_row.reshape(1, lane)

    # --- choose the row tile (~target_tile_bytes per f32 tile) -------------
    bytes_per_row = lane * 4
    tile_rows = max(8, (target_tile_bytes // bytes_per_row) // 8 * 8)
    if rows <= tile_rows:
        # Single block covering the full array (block == full dims is legal).
        tile_rows = rows
        rows_padded = rows
    else:
        rows_padded = pl.cdiv(rows, tile_rows) * tile_rows
        if rows_padded != rows:
            xw = jnp.pad(xw, ((0, rows_padded - rows), (0, 0)))

    grid = (rows_padded // tile_rows,)

    param_spec = pl.BlockSpec((1, lane), lambda i: (0, 0))
    out = pl.pallas_call(
        _triangular_membership_kernel,
        out_shape=jax.ShapeDtypeStruct((rows_padded, lane), jnp.float32),
        grid_spec=pltpu.PrefetchScalarGridSpec(
            num_scalar_prefetch=0,
            grid=grid,
            in_specs=[
                pl.BlockSpec((tile_rows, lane), lambda i: (i, 0)),  # X tile
                param_spec,                                         # a
                param_spec,                                         # c
                param_spec,                                         # 1/clamp(b-a)
                param_spec,                                         # 1/clamp(c-b)
            ],
            out_specs=pl.BlockSpec((tile_rows, lane), lambda i: (i, 0)),
        ),
        compiler_params=pltpu.CompilerParams(
            dimension_semantics=("parallel",),
        ),
    )(xw, a_row, c_row, il_row, ir_row)

    out = out[:rows]
    if mode == "flatten":
        out = out.reshape(N, D)
    elif mode == "pad":
        out = out[:, :D]
    return out


def triangular_membership_ref(x, a, b, c):
    left = (x - a) / jnp.maximum(b - a, 1e-8)
    right = (c - x) / jnp.maximum(c - b, 1e-8)
    return jnp.maximum(jnp.minimum(left, right), 0.0)


if __name__ == "__main__":
    key = jax.random.PRNGKey(0)

    # Main demo shape consistent with the module: X is (N x input_dim).
    # NOTE: at this tiny size the op is pure pallas_call overhead; the kernel
    # only pays off at large N (where tiling / lane-densification matter).
    N, input_dim = 8, 32
    k_x, k_a, k_b, k_c = jax.random.split(key, 4)
    x = jax.random.normal(k_x, (N, input_dim), dtype=jnp.float32)
    a = jax.random.normal(k_a, (input_dim,), dtype=jnp.float32)
    b = jax.random.normal(k_b, (input_dim,), dtype=jnp.float32)
    c = jax.random.normal(k_c, (input_dim,), dtype=jnp.float32)

    out = jax.block_until_ready(triangular_membership(x, a, b, c))
    ref = triangular_membership_ref(x, a, b, c)
    assert out.shape == (N, input_dim)
    assert jnp.allclose(out, ref, atol=1e-5, rtol=1e-5)

    # Secondary small check exercising the lane-padding path (D not 128-friendly).
    N2, D2 = 16, 20
    k_x2, k_a2, k_b2, k_c2 = jax.random.split(jax.random.PRNGKey(1), 4)
    x2 = jax.random.normal(k_x2, (N2, D2), dtype=jnp.float32)
    a2 = jax.random.normal(k_a2, (D2,), dtype=jnp.float32)
    b2 = jax.random.normal(k_b2, (D2,), dtype=jnp.float32)
    c2 = jax.random.normal(k_c2, (D2,), dtype=jnp.float32)
    out2 = jax.block_until_ready(triangular_membership(x2, a2, b2, c2))
    ref2 = triangular_membership_ref(x2, a2, b2, c2)
    assert out2.shape == (N2, D2)
    assert jnp.allclose(out2, ref2, atol=1e-5, rtol=1e-5)

    print("KERNEL_OK")
</pallas_src>

<mosaic_0001>
module attributes {stable_mosaic.version = 11 : i64} {
  func.func @_triangular_membership_kernel(%arg0: i32, %arg1: memref<2x128xf32, #tpu.memory_space<vmem>>, %arg2: memref<1x128xf32, #tpu.memory_space<vmem>>, %arg3: memref<1x128xf32, #tpu.memory_space<vmem>>, %arg4: memref<1x128xf32, #tpu.memory_space<vmem>>, %arg5: memref<1x128xf32, #tpu.memory_space<vmem>>, %arg6: memref<2x128xf32, #tpu.memory_space<vmem>>) attributes {dimension_semantics = [#tpu.dimension_semantics<parallel>], iteration_bounds = array<i64: 1>, scalar_prefetch = 0 : i64, scratch_operands = 0 : i64, tpu.core_type = #tpu.core_type<tc>, window_params = [{transform_indices = @transform_0, window_bounds = array<i64: 2, 128>}, {pipeline_mode = #tpu.pipeline_mode<synchronous>, transform_indices = @transform_1, window_bounds = array<i64: 1, 128>}, {pipeline_mode = #tpu.pipeline_mode<synchronous>, transform_indices = @transform_2, window_bounds = array<i64: 1, 128>}, {pipeline_mode = #tpu.pipeline_mode<synchronous>, transform_indices = @transform_3, window_bounds = array<i64: 1, 128>}, {pipeline_mode = #tpu.pipeline_mode<synchronous>, transform_indices = @transform_4, window_bounds = array<i64: 1, 128>}, {transform_indices = @transform_5, window_bounds = array<i64: 2, 128>}]} {
    %c0 = arith.constant 0 : index
    %c0_0 = arith.constant 0 : index
    %0 = vector.load %arg1[%c0, %c0_0] : memref<2x128xf32, #tpu.memory_space<vmem>>, vector<2x128xf32>
    %c0_1 = arith.constant 0 : index
    %c0_2 = arith.constant 0 : index
    %1 = vector.load %arg2[%c0_1, %c0_2] : memref<1x128xf32, #tpu.memory_space<vmem>>, vector<1x128xf32>
    %2 = vector.broadcast %1 : vector<1x128xf32> to vector<2x128xf32>
    %3 = arith.subf %0, %2 : vector<2x128xf32>
    %c0_3 = arith.constant 0 : index
    %c0_4 = arith.constant 0 : index
    %4 = vector.load %arg4[%c0_3, %c0_4] : memref<1x128xf32, #tpu.memory_space<vmem>>, vector<1x128xf32>
    %5 = vector.broadcast %4 : vector<1x128xf32> to vector<2x128xf32>
    %6 = arith.mulf %3, %5 : vector<2x128xf32>
    %c0_5 = arith.constant 0 : index
    %c0_6 = arith.constant 0 : index
    %7 = vector.load %arg3[%c0_5, %c0_6] : memref<1x128xf32, #tpu.memory_space<vmem>>, vector<1x128xf32>
    %8 = vector.broadcast %7 : vector<1x128xf32> to vector<2x128xf32>
    %9 = arith.subf %8, %0 : vector<2x128xf32>
    %c0_7 = arith.constant 0 : index
    %c0_8 = arith.constant 0 : index
    %10 = vector.load %arg5[%c0_7, %c0_8] : memref<1x128xf32, #tpu.memory_space<vmem>>, vector<1x128xf32>
    %11 = vector.broadcast %10 : vector<1x128xf32> to vector<2x128xf32>
    %12 = arith.mulf %9, %11 : vector<2x128xf32>
    %13 = arith.minimumf %6, %12 : vector<2x128xf32>
    %cst = arith.constant 0.000000e+00 : f32
    %14 = vector.broadcast %cst : f32 to vector<2x128xf32>
    %15 = arith.maximumf %13, %14 : vector<2x128xf32>
    %c0_9 = arith.constant 0 : index
    %c0_10 = arith.constant 0 : index
    %16 = vector.load %arg6[%c0_9, %c0_10] : memref<2x128xf32, #tpu.memory_space<vmem>>, vector<2x128xf32>
    tpu.vector_store %arg6[%c0_9, %c0_10], %15 {strides = array<i32>} : memref<2x128xf32, #tpu.memory_space<vmem>>, vector<2x128xf32>,
    return
  }
  func.func @transform_0(%arg0: i32) -> (i32, i32) {
    %c0_i32 = arith.constant 0 : i32
    %c0_i32_0 = arith.constant 0 : i32
    return %arg0, %c0_i32 : i32, i32
  }
  func.func @transform_1(%arg0: i32) -> (i32, i32) {
    %c0_i32 = arith.constant 0 : i32
    %c0_i32_0 = arith.constant 0 : i32
    %c0_i32_1 = arith.constant 0 : i32
    return %c0_i32, %c0_i32_0 : i32, i32
  }
  func.func @transform_2(%arg0: i32) -> (i32, i32) {
    %c0_i32 = arith.constant 0 : i32
    %c0_i32_0 = arith.constant 0 : i32
    %c0_i32_1 = arith.constant 0 : i32
    return %c0_i32, %c0_i32_0 : i32, i32
  }
  func.func @transform_3(%arg0: i32) -> (i32, i32) {
    %c0_i32 = arith.constant 0 : i32
    %c0_i32_0 = arith.constant 0 : i32
    %c0_i32_1 = arith.constant 0 : i32
    return %c0_i32, %c0_i32_0 : i32, i32
  }
  func.func @transform_4(%arg0: i32) -> (i32, i32) {
    %c0_i32 = arith.constant 0 : i32
    %c0_i32_0 = arith.constant 0 : i32
    %c0_i32_1 = arith.constant 0 : i32
    return %c0_i32, %c0_i32_0 : i32, i32
  }
  func.func @transform_5(%arg0: i32) -> (i32, i32) {
    %c0_i32 = arith.constant 0 : i32
    %c0_i32_0 = arith.constant 0 : i32
    return %arg0, %c0_i32 : i32, i32
  }
}

</mosaic_0001>

<bundles_post_ra>
// kernel: tpu_custom_call.1
= control target key start
LH: loop header
LB: loop body
LE: loop exit
PB: predicated region body
PF: predicated region fallthrough
CT: control target
= control target key end

     0   :  { %10 = vsyncpa [#allocation3], 0  ;;  %s227_s0 = inlined_call_operand.hbm [shape: f32[2,128], index: 0, kind: input, shape index: {}]   ;;  %s228_s1 = inlined_call_operand.hbm [shape: f32[1,128], index: 1, kind: input, shape index: {}]   ;;  %s229_s2 = inlined_call_operand.vmem [shape: f32[1,128], index: 2, kind: input, shape index: {}]   ;;  %s230_s3 = inlined_call_operand.vmem [shape: f32[1,128], index: 3, kind: input, shape index: {}]   ;;  %s231_s4 = inlined_call_operand.vmem [shape: f32[1,128], index: 4, kind: input, shape index: {}]   ;;  %s232_s5 = inlined_call_operand.hbm [shape: f32[2,128], index: 5, kind: output, shape index: {}]  }
   0x1   :  { %11 = vsyncpa [#allocation6], 0 }
   0x2   :  { %12 = vsyncpa [#allocation4], 0  ;;  %s18_s20 = sshll.u32 %s227_s0, 4  ;;  %s176_s21 = smov [#allocation2]   ;;  %s19_s20 = int_to_ptr.hbm [resolvable:$true] %s18_s20 }
   0x3   :  { %s20_s22 = sshll.u32 %s176_s21, 4  ;;  %s29_s25 = sshll.u32 %s228_s1, 4  ;;  %s21_s22 = int_to_ptr.vmem [resolvable:$true] %s20_s22  ;;  %s30_s25 = int_to_ptr.hbm [resolvable:$true] %s29_s25 }
   0x4   :  { %23 = dma.hbm_to_vmem [thread:$0]  %s19_s20, 32, %s21_s22, [#allocation3]  }
   0x5   :  { %s177_s26 = smov [#allocation5]  }
   0x6   :  { %s31_s27 = sshll.u32 %s177_s26, 4  ;;  %s32_s27 = int_to_ptr.vmem [resolvable:$true] %s31_s27 }
   0x7   :  { %34 = dma.hbm_to_vmem [thread:$0]  %s30_s25, 16, %s32_s27, [#allocation6]  }
   0x8   :  { %170 = dma.done.wait [#allocation3], 32  }
   0x9   :  { %171 = vsyncadd [#allocation3], 4294967264 }
   0xa   :  { %172 = dma.done.wait [#allocation6], 16  }
   0xb   :  { %173 = vsyncadd [#allocation6], 4294967280  ;;  %v49_v0 = vld [vmem:[#allocation2] sm:$0x3]  ;;  %v94_v1 = vld [vmem:[#allocation5] ss:$0 sm:$0xff] }
   0xc   :  { %v95_v2 = vld [vmem:[%s230_s3] ss:$0 sm:$0xff]  ;;  %v54_v3 = vsub.f32 %v49_v0, %v94_v1  ;;  %s178_s7 = smov [#allocation7]   ;;  %s80_s11 = sshll.u32 %s232_s5, 4  ;;  %s81_s11 = int_to_ptr.hbm [resolvable:$true] %s80_s11 }
   0xd   :  { %v96_v4 = vld [vmem:[%s229_s2] ss:$0 sm:$0xff]  ;;  %s78_s8 = sshll.u32 %s178_s7, 4  ;;  %s79_s8 = int_to_ptr.vmem [resolvable:$true] %s78_s8 }
   0xe   :  { %v97_v5 = vld [vmem:[%s231_s4] ss:$0 sm:$0xff]  ;;  %v59_v6 = vmul.f32 %v95_v2, %v54_v3  ;;  %v64_v7 = vsub.f32 %v96_v4, %v49_v0 }
  0x10   :  { %v69_v8 = vmul.f32 %v97_v5, %v64_v7 }
  0x12   :  { %v70_v9 = vmin.f32 %v59_v6, %v69_v8 }
  0x14   :  { %v71_v10 = vmax.f32 %v70_v9, 0.0 }
  0x16   :  { %72 = vst [vmem:[#allocation7] sm:$0x3] %v71_v10 }
  0x17   :  { %83 = dma.vmem_to_hbm [thread:$0]  %s79_s8, 32, %s81_s11, [#allocation4]  }
  0x18   :  { %174 = dma.done.wait [#allocation4], 32  }
  0x19   :  { %175 = vsyncadd [#allocation4], 4294967264 }
  0x1a   :  { %88 = vsyncpa [#allocation3], 1 }
  0x1b   :  { %89 = vsyncpa [#allocation6], 1 }
  0x1c   :  { %90 = vsyncpa [#allocation4], 1 }

</bundles_post_ra>
